<compile_context>
chip_gen: v6e
topology: v6e:2x2x1
jax: 0.10.0
libtpu: 0.0.40
codegen_flags: <defaults>
</compile_context>

<pallas_src>
import functools

import jax
import jax.numpy as jnp
from jax.experimental import pallas as pl
from jax.experimental.pallas import tpu as pltpu

NUM_CLASSES = 26


def _round_up(x, m):
    return ((x + m - 1) // m) * m


def _hp_partial_kernel(f_ref, w_ref, o_ref, acc_ref, *, inv_hw, batch):
    # grid = (num_splits, num_channel_tiles); axis 1 is the channel reduction.
    k = pl.program_id(1)

    @pl.when(k == 0)
    def _():
        acc_ref[...] = jnp.zeros_like(acc_ref)

    # Contract over the channel tile on the MXU:  (cls_pad, tile_c) @
    # (tile_c, HW) -> (cls_pad, HW) per sample.  Channels (the big axis) are
    # the matmul K dimension, so the feature stream feeds the MXU directly in
    # its native NCHW layout — no transposes anywhere.
    wv = w_ref[...]                                    # (cls_pad, tile_c)
    for n in range(batch):                             # static, small batch
        acc_ref[n] += jnp.dot(wv, f_ref[n],
                              preferred_element_type=jnp.float32)

    @pl.when(k == pl.num_programs(1) - 1)
    def _():
        # F.avg_pool2d(kernel_size=8) over the full 8x8 window == mean over
        # the HW axis.  Done once, on the tiny (batch, cls_pad, HW) f32
        # accumulator (cheap XLU reduce), then scaled by 1/HW.
        pooled = jnp.sum(acc_ref[...], axis=-1) * inv_hw   # (batch, cls_pad)
        o_ref[...] = pooled[None]                          # (1, batch, cls_pad)


def _hp_partial(feat_nchw, w_slice, *, num_splits, max_tile_c, cls_pad,
                vmem_limit_bytes):
    """Partial fc output for one backbone feature map.

    feat_nchw: (N, C_i, H, W) float32, H*W == pooled window (8*8).
    w_slice:   (num_classes, C_i) slice of the fc weight.
    Returns (N, cls_pad) float32 partial logits (no bias).
    """
    n, c, h, w = feat_nchw.shape
    hw = h * w
    num_classes = w_slice.shape[0]

    # Free reshape (contiguous last two dims): (N, C, HW).
    f = feat_nchw.reshape(n, c, hw).astype(jnp.float32)

    # ---- channel tiling ----------------------------------------------------
    c128 = _round_up(c, 128)
    splits = max(1, min(num_splits, c128 // 128))
    per_split = _round_up((c128 + splits - 1) // splits, 128)
    max_tile = max(128, (max_tile_c // 128) * 128)
    max_tile = min(max_tile, per_split)

    # Largest tile (multiple of 128) whose chunk evenly divides the channel
    # count -> avoids a host-side zero-pad pass over the (large) features.
    tile_c = 128
    t = max_tile
    while t >= 128:
        if c128 % (splits * t) == 0:
            tile_c = t
            break
        t -= 128
    chunk = splits * tile_c
    c_pad = _round_up(c128, chunk)
    kt = c_pad // chunk                      # channel tiles per split

    if c_pad != c:
        # Zero channels contribute nothing (their fc weights are zero too).
        f = jnp.pad(f, ((0, 0), (0, c_pad - c), (0, 0)))
    wk = jnp.pad(w_slice.astype(jnp.float32),
                 ((0, cls_pad - num_classes), (0, c_pad - c)))

    kernel = functools.partial(_hp_partial_kernel, inv_hw=1.0 / float(hw),
                               batch=n)

    # TODO(synk): at real scale, sweep pipeline_mode=pl.Buffered(3) on the
    # feature BlockSpec (per-tile compute is tiny vs. its DMA time).
    partial = pl.pallas_call(
        kernel,
        out_shape=jax.ShapeDtypeStruct((splits, n, cls_pad), jnp.float32),
        grid=(splits, kt),
        in_specs=[
            pl.BlockSpec((n, tile_c, hw), lambda p, k: (0, p * kt + k, 0)),
            pl.BlockSpec((cls_pad, tile_c), lambda p, k: (0, p * kt + k)),
        ],
        out_specs=pl.BlockSpec((1, n, cls_pad), lambda p, k: (p, 0, 0)),
        scratch_shapes=[pltpu.VMEM((n, cls_pad, hw), jnp.float32)],
        compiler_params=pltpu.CompilerParams(
            dimension_semantics=("parallel", "arbitrary"),
            vmem_limit_bytes=vmem_limit_bytes),
    )(f, wk)

    # Combine per-TensorCore partial sums (trivial XLA add on a tiny array).
    return partial.sum(axis=0)                       # (N, cls_pad)


def hp_head(feats_nchw, fc_w, fc_b, *, num_classes=NUM_CLASSES,
            max_tile_c=2048, num_splits=2, vmem_limit_bytes=64 << 20):
    """HP head: torch.cat(dim=1) -> avg_pool2d(8) -> flatten -> fc.

    feats_nchw: list of (N, C_i, H, W) float32 feature maps (NCHW, H=W=8,
                i.e. the spatial extent equals the pooling window, matching
                fc.in_features = sum(C_i)).
    fc_w: (num_classes, sum(C_i)); fc_b: (num_classes,).
    Returns (N, num_classes) float32.

    The channel concat is realized as a sum of per-backbone partial fc
    outputs, so each feature tensor is streamed from HBM exactly once.
    """
    cls_pad = _round_up(num_classes, 8)              # sublane-aligned M dim

    acc = None
    off = 0
    for f in feats_nchw:
        c_i = f.shape[1]
        w_slice = fc_w[:, off:off + c_i]             # static slice (small)
        part = _hp_partial(f, w_slice, num_splits=num_splits,
                           max_tile_c=max_tile_c, cls_pad=cls_pad,
                           vmem_limit_bytes=vmem_limit_bytes)
        acc = part if acc is None else acc + part
        off += c_i

    # TODO(synk): F.dropout(training=True) is not modeled; inference-mode
    # dropout is the identity, which is what we compute here.
    return acc[:, :num_classes] + fc_b.reshape(1, num_classes)


# ---------------------------------------------------------------------------
# Deterministic stand-in backbones (glue, plain JAX).
# TODO(synk): Incep.inception_v3 / AF_1.AF1 / AF_2.AF2 / AF_3.AF3 are external
# modules not provided; replaced with a 2x2 avg-pool + 1x1 conv + ReLU.
# ---------------------------------------------------------------------------
def stub_backbone(x, w):
    # x: (N, Cin, H, W) -> (N, Cout, H/2, W/2), NCHW throughout.
    n, cin, h, wd = x.shape
    xp = x.reshape(n, cin, h // 2, 2, wd // 2, 2).mean(axis=(3, 5))
    f = jnp.einsum('oc,nchw->nohw', w, xp)
    return jax.nn.relu(f)


if __name__ == "__main__":
    key = jax.random.PRNGKey(0)
    ks = jax.random.split(key, 8)

    N, CIN, H, W = 2, 3, 16, 16               # small NCHW conv input
    C0, C1, C2, C3 = 256, 128, 64, 64         # scaled-down (real: 2048*73 total)
    C_TOTAL = C0 + C1 + C2 + C3

    x = jax.random.normal(ks[0], (N, CIN, H, W), jnp.float32)

    # stand-in backbone weights
    w_mnet = 0.1 * jax.random.normal(ks[1], (C0, CIN), jnp.float32)
    w_af1 = 0.1 * jax.random.normal(ks[2], (C1, CIN), jnp.float32)
    w_af2 = 0.1 * jax.random.normal(ks[3], (C2, CIN), jnp.float32)
    w_af3 = 0.1 * jax.random.normal(ks[4], (C3, CIN), jnp.float32)

    F0 = stub_backbone(x, w_mnet)   # (N, C0, 8, 8)
    F1 = stub_backbone(x, w_af1)    # (N, C1, 8, 8)
    F2 = stub_backbone(x, w_af2)    # (N, C2, 8, 8)
    F3 = stub_backbone(x, w_af3)    # (N, C3, 8, 8)

    # fc = nn.Linear(C_TOTAL, NUM_CLASSES): deterministic init
    fc_w = jax.random.normal(ks[5], (NUM_CLASSES, C_TOTAL), jnp.float32) / jnp.sqrt(C_TOTAL)
    fc_b = 0.01 * jax.random.normal(ks[6], (NUM_CLASSES,), jnp.float32)

    out = hp_head([F0, F1, F2, F3], fc_w, fc_b)
    out = jax.block_until_ready(out)

    # pure-JAX reference of the HP head (cat -> avg_pool2d(8) -> flatten -> fc)
    cat = jnp.concatenate([F0, F1, F2, F3], axis=1)           # (N, C_TOTAL, 8, 8)
    pooled = cat.mean(axis=(2, 3))                            # avg_pool2d(8) -> (N, C_TOTAL)
    ref = pooled @ fc_w.T + fc_b                              # (N, NUM_CLASSES)

    assert out.shape == (N, NUM_CLASSES)
    assert jnp.allclose(out, ref, atol=1e-4, rtol=1e-4), "mismatch vs reference"
    print("KERNEL_OK")
</pallas_src>

<mosaic_0001>
module attributes {stable_mosaic.version = 11 : i64} {
  func.func @_hp_partial_kernel(%arg0: i32, %arg1: i32, %arg2: memref<2x128x64xf32, #tpu.memory_space<vmem>>, %arg3: memref<32x128xf32, #tpu.memory_space<vmem>>, %arg4: memref<1x2x32xf32, #tpu.memory_space<vmem>>, %arg5: memref<2x32x64xf32, #tpu.memory_space<vmem>>) attributes {dimension_semantics = [#tpu.dimension_semantics<parallel>, #tpu.dimension_semantics<arbitrary>], iteration_bounds = array<i64: 2, 1>, scalar_prefetch = 0 : i64, scratch_operands = 1 : i64, tpu.core_type = #tpu.core_type<tc>, window_params = [{transform_indices = @transform_0, window_bounds = array<i64: 2, 128, 64>}, {transform_indices = @transform_1, window_bounds = array<i64: 32, 128>}, {transform_indices = @transform_2, window_bounds = array<i64: 1, 2, 32>}]} {
    %c0_i32 = arith.constant 0 : i32
    %0 = arith.cmpi eq, %arg1, %c0_i32 : i32
    %1 = arith.extui %0 : i1 to i32
    %c0_i32_0 = arith.constant 0 : i32
    %2 = arith.cmpi ne, %1, %c0_i32_0 : i32
    scf.if %2 {
      %cst_22 = arith.constant 0.000000e+00 : f32
      %25 = vector.broadcast %cst_22 : f32 to vector<2x32x64xf32>
      %c0_23 = arith.constant 0 : index
      %c0_24 = arith.constant 0 : index
      %c0_25 = arith.constant 0 : index
      %26 = vector.load %arg5[%c0_23, %c0_24, %c0_25] : memref<2x32x64xf32, #tpu.memory_space<vmem>>, vector<2x32x64xf32>
      tpu.vector_store %arg5[%c0_23, %c0_24, %c0_25], %25 {strides = array<i32>} : memref<2x32x64xf32, #tpu.memory_space<vmem>>, vector<2x32x64xf32>,
    } else {
    }
    %c0 = arith.constant 0 : index
    %c0_1 = arith.constant 0 : index
    %3 = vector.load %arg3[%c0, %c0_1] : memref<32x128xf32, #tpu.memory_space<vmem>>, vector<32x128xf32>
    %c0_2 = arith.constant 0 : index
    %c0_3 = arith.constant 0 : index
    %c0_4 = arith.constant 0 : index
    %4 = vector.load %arg5[%c0_2, %c0_3, %c0_4] : memref<2x32x64xf32, #tpu.memory_space<vmem>>, vector<1x32x64xf32>
    %5 = vector.shape_cast %4 : vector<1x32x64xf32> to vector<32x64xf32>
    %c0_5 = arith.constant 0 : index
    %c0_6 = arith.constant 0 : index
    %c0_7 = arith.constant 0 : index
    %6 = vector.load %arg2[%c0_5, %c0_6, %c0_7] : memref<2x128x64xf32, #tpu.memory_space<vmem>>, vector<1x128x64xf32>
    %7 = vector.shape_cast %6 : vector<1x128x64xf32> to vector<128x64xf32>
    %cst = arith.constant dense<0.000000e+00> : vector<32x64xf32>
    %8 = tpu.matmul %3, %7, %cst {dimension_numbers = #tpu.dot_dimension_numbers<[1], [0], [0], [1], [0, 0, 1, 1], [], []>} : vector<32x128xf32>, vector<128x64xf32>, vector<32x64xf32> -> vector<32x64xf32>
    %9 = arith.addf %5, %8 : vector<32x64xf32>
    %c0_8 = arith.constant 0 : index
    %c0_9 = arith.constant 0 : index
    %c0_10 = arith.constant 0 : index
    %10 = vector.load %arg5[%c0_8, %c0_9, %c0_10] : memref<2x32x64xf32, #tpu.memory_space<vmem>>, vector<1x32x64xf32>
    %11 = vector.shape_cast %10 : vector<1x32x64xf32> to vector<32x64xf32>
    %12 = vector.shape_cast %9 : vector<32x64xf32> to vector<1x32x64xf32>
    tpu.vector_store %arg5[%c0_8, %c0_9, %c0_10], %12 {strides = array<i32>} : memref<2x32x64xf32, #tpu.memory_space<vmem>>, vector<1x32x64xf32>,
    %c1 = arith.constant 1 : index
    %c0_11 = arith.constant 0 : index
    %c0_12 = arith.constant 0 : index
    %13 = vector.load %arg5[%c1, %c0_11, %c0_12] : memref<2x32x64xf32, #tpu.memory_space<vmem>>, vector<1x32x64xf32>
    %14 = vector.shape_cast %13 : vector<1x32x64xf32> to vector<32x64xf32>
    %c1_13 = arith.constant 1 : index
    %c0_14 = arith.constant 0 : index
    %c0_15 = arith.constant 0 : index
    %15 = vector.load %arg2[%c1_13, %c0_14, %c0_15] : memref<2x128x64xf32, #tpu.memory_space<vmem>>, vector<1x128x64xf32>
    %16 = vector.shape_cast %15 : vector<1x128x64xf32> to vector<128x64xf32>
    %cst_16 = arith.constant dense<0.000000e+00> : vector<32x64xf32>
    %17 = tpu.matmul %3, %16, %cst_16 {dimension_numbers = #tpu.dot_dimension_numbers<[1], [0], [0], [1], [0, 0, 1, 1], [], []>} : vector<32x128xf32>, vector<128x64xf32>, vector<32x64xf32> -> vector<32x64xf32>
    %18 = arith.addf %14, %17 : vector<32x64xf32>
    %c1_17 = arith.constant 1 : index
    %c0_18 = arith.constant 0 : index
    %c0_19 = arith.constant 0 : index
    %19 = vector.load %arg5[%c1_17, %c0_18, %c0_19] : memref<2x32x64xf32, #tpu.memory_space<vmem>>, vector<1x32x64xf32>
    %20 = vector.shape_cast %19 : vector<1x32x64xf32> to vector<32x64xf32>
    %21 = vector.shape_cast %18 : vector<32x64xf32> to vector<1x32x64xf32>
    tpu.vector_store %arg5[%c1_17, %c0_18, %c0_19], %21 {strides = array<i32>} : memref<2x32x64xf32, #tpu.memory_space<vmem>>, vector<1x32x64xf32>,
    %c0_i32_20 = arith.constant 0 : i32
    %22 = arith.cmpi eq, %arg1, %c0_i32_20 : i32
    %23 = arith.extui %22 : i1 to i32
    %c0_i32_21 = arith.constant 0 : i32
    %24 = arith.cmpi ne, %23, %c0_i32_21 : i32
    scf.if %24 {
      %c0_22 = arith.constant 0 : index
      %c0_23 = arith.constant 0 : index
      %c0_24 = arith.constant 0 : index
      %25 = vector.load %arg5[%c0_22, %c0_23, %c0_24] : memref<2x32x64xf32, #tpu.memory_space<vmem>>, vector<2x32x64xf32>
      %cst_25 = arith.constant dense<0.000000e+00> : vector<2x32xf32>
      %26 = vector.multi_reduction <add>, %25, %cst_25 [2] : vector<2x32x64xf32> to vector<2x32xf32>
      %cst_26 = arith.constant 1.562500e-02 : f32
      %27 = vector.broadcast %cst_26 : f32 to vector<2x32xf32>
      %28 = arith.mulf %26, %27 : vector<2x32xf32>
      %29 = vector.shape_cast %28 : vector<2x32xf32> to vector<1x2x32xf32>
      %c0_27 = arith.constant 0 : index
      %c0_28 = arith.constant 0 : index
      %c0_29 = arith.constant 0 : index
      %30 = vector.load %arg4[%c0_27, %c0_28, %c0_29] : memref<1x2x32xf32, #tpu.memory_space<vmem>>, vector<1x2x32xf32>
      tpu.vector_store %arg4[%c0_27, %c0_28, %c0_29], %29 {strides = array<i32>} : memref<1x2x32xf32, #tpu.memory_space<vmem>>, vector<1x2x32xf32>,
    } else {
    }
    return
  }
  func.func @transform_0(%arg0: i32, %arg1: i32) -> (i32, i32, i32) {
    %c1_i32 = arith.constant 1 : i32
    %0 = arith.muli %arg0, %c1_i32 : i32
    %1 = arith.addi %0, %arg1 : i32
    %c0_i32 = arith.constant 0 : i32
    %c0_i32_0 = arith.constant 0 : i32
    %c0_i32_1 = arith.constant 0 : i32
    return %c0_i32, %1, %c0_i32_0 : i32, i32, i32
  }
  func.func @transform_1(%arg0: i32, %arg1: i32) -> (i32, i32) {
    %c1_i32 = arith.constant 1 : i32
    %0 = arith.muli %arg0, %c1_i32 : i32
    %1 = arith.addi %0, %arg1 : i32
    %c0_i32 = arith.constant 0 : i32
    %c0_i32_0 = arith.constant 0 : i32
    return %c0_i32, %1 : i32, i32
  }
  func.func @transform_2(%arg0: i32, %arg1: i32) -> (i32, i32, i32) {
    %c0_i32 = arith.constant 0 : i32
    %c0_i32_0 = arith.constant 0 : i32
    %c0_i32_1 = arith.constant 0 : i32
    return %arg0, %c0_i32, %c0_i32_0 : i32, i32, i32
  }
}

</mosaic_0001>

<bundles_post_ra>
// kernel: tpu_custom_call.1
= control target key start
LH: loop header
LB: loop body
LE: loop exit
PB: predicated region body
PF: predicated region fallthrough
CT: control target
= control target key end

     0   :  { %7 = vsyncpa [#allocation6], 0  ;;  %s1405_s0 = inlined_call_operand.vmem [shape: f32[2,256,64], index: 0, kind: input, shape index: {}]   ;;  %s1406_s1 = inlined_call_operand.vmem [shape: f32[32,256], index: 1, kind: input, shape index: {}]   ;;  %s1407_s2 = inlined_call_operand.hbm [shape: f32[2,2,32], index: 2, kind: output, shape index: {}]  }
   0x1   :  { %9 = vsyncpa [#allocation6 + $0x1], 0  ;;  %s1146_s9 = smov 0   ;;  %s1148_s10 = smov 0  }
   0x2   :  { %s1150_s11 = smov 0   ;;  %s1152_s12 = smov 0  }
   0x3   :  { %s1154_s13 = smov 0   ;;  %s1156_s14 = smov 0  }
   0x4 LB: > { %s845_s15 = sadd.s32 4294967295, %s1127_s14   ;;  %s846_s16 = sadd.s32 4294967294, %s1127_s14   ;;  %s1127_s14 = sphi %s1156_s14, %s15_s14   ;;  %s1123_s13 = sphi %s1154_s13, %s1415_s13   ;;  %s1119_s12 = sphi %s1152_s12, %s1414_s12   ;;  %s1115_s11 = sphi %s1150_s11, %s1413_s11   ;;  %s1111_s10 = sphi %s1148_s10, %s1412_s10   ;;  %s1107_s9 = sphi %s1146_s9, %s1411_s9  }
   0x5   : > { %s27_s17 = sadd.s32 1, %s1123_s13  ;;  %s36_s18 = sadd.s32 1, %s1115_s11 }
   0x6   : > { %p29_p0 = scmp.ge.s32.totalorder %s27_s17, 2  ;;  %p43_p1 = scmp.ne.s32.totalorder %s1115_s11, %s1111_s10 }
   0x7   : > { %p44_p2 = scmp.eq.s32.totalorder %s1127_s14, 0  ;;  %p101_p3 = scmp.eq.s32.totalorder %s845_s15, 1 }
   0x8   : > { %s1417_s17 = smov (%p29_p0, %s27_s17), 0  ;;  %p106_p6 = scmp.ne.s32.totalorder %s1111_s10, %s1107_s9 }
   0x9   : > { %p1185_p4 = por %p44_p2, %p43_p1  ;;  %p1189_p5 = por %p101_p3, %p43_p1 }
   0xa   : > { %s33_s21 = ssub.s32 %s1123_s13, %s1417_s17  ;;  %p107_p8 = scmp.eq.s32.totalorder %s846_s16, 1 }
   0xb   : > { %p34_p7 = scmp.eq.s32.totalorder %s33_s21, 0  ;;  %p848_p10 = scmp.ge.s32.totalorder %s1127_s14, 2 }
   0xc   : > { %p1200_p9 = por %p107_p8, %p106_p6 }
   0xd   : > { %s1198_s22 = scalar_select %p34_p7, %s1115_s11, %s36_s18  }
   0xe   : > { %123 = sbr.rel (%p848_p10) target bundleno = 45 (0x2d), region = 16 }
  0x13   : > { %126 = sbr.rel (!%p1185_p4) target bundleno = 39 (0x27), region = 20  ;;  %s128_s24 = sand.u32 (%p1185_p4), 1, %s1115_s11  }
  0x14   : > { %s878_s25 = sshll.u32 (%p1185_p4), %s1123_s13, 7  ;;  %s849_s26 = sshll.u32 (%p1185_p4), %s128_s24, 8 }
  0x15   : > { %s1214_s29 = scalar_lea.vmem (%p1185_p4), %s1405_s0, %s878_s25  ;;  %s1219_s30 = scalar_lea.vmem (%p1185_p4), [#allocation3], %s849_s26 }
  0x16   : > { %v225_v0 = vld [vmem:[%s1214_s29] sm:$0xff] (%p1185_p4)  ;;  %v227_v1 = vld [vmem:[%s1214_s29 + $0x8] sm:$0xff] (%p1185_p4)  ;;  %v229_v2 = vld [vmem:[%s1214_s29 + $0x10] sm:$0xff] (%p1185_p4) }
  0x17   : > { %226 = vst [vmem:[%s1219_s30] sm:$0xff] (%p1185_p4), %v225_v0  ;;  %228 = vst [vmem:[%s1219_s30 + $0x8] sm:$0xff] (%p1185_p4), %v227_v1  ;;  %v231_v3 = vld [vmem:[%s1214_s29 + $0x18] sm:$0xff] (%p1185_p4)  ;;  %v233_v4 = vld [vmem:[%s1214_s29 + $0x20] sm:$0xff] (%p1185_p4) }
  0x18   : > { %230 = vst [vmem:[%s1219_s30 + $0x10] sm:$0xff] %v229_v2  ;;  %v235_v5 = vld [vmem:[%s1214_s29 + $0x28] sm:$0xff]  ;;  %232 = vst [vmem:[%s1219_s30 + $0x18] sm:$0xff] %v231_v3  ;;  %v237_v6 = vld [vmem:[%s1214_s29 + $0x30] sm:$0xff] }
  0x19   : > { %234 = vst [vmem:[%s1219_s30 + $0x20] sm:$0xff] %v233_v4  ;;  %236 = vst [vmem:[%s1219_s30 + $0x28] sm:$0xff] %v235_v5  ;;  %v239_v7 = vld [vmem:[%s1214_s29 + $0x38] sm:$0xff]  ;;  %v241_v8 = vld [vmem:[%s1214_s29 + $0x40] sm:$0xff] }
  0x1a   : > { %238 = vst [vmem:[%s1219_s30 + $0x30] sm:$0xff] %v237_v6  ;;  %240 = vst [vmem:[%s1219_s30 + $0x38] sm:$0xff] %v239_v7  ;;  %v243_v9 = vld [vmem:[%s1214_s29 + $0x48] sm:$0xff]  ;;  %v245_v10 = vld [vmem:[%s1214_s29 + $0x50] sm:$0xff] }
  0x1b   : > { %242 = vst [vmem:[%s1219_s30 + $0x40] sm:$0xff] %v241_v8  ;;  %v247_v11 = vld [vmem:[%s1214_s29 + $0x58] sm:$0xff]  ;;  %244 = vst [vmem:[%s1219_s30 + $0x48] sm:$0xff] %v243_v9  ;;  %v249_v12 = vld [vmem:[%s1214_s29 + $0x60] sm:$0xff] }
  0x1c   : > { %246 = vst [vmem:[%s1219_s30 + $0x50] sm:$0xff] %v245_v10  ;;  %248 = vst [vmem:[%s1219_s30 + $0x58] sm:$0xff] %v247_v11  ;;  %v251_v13 = vld [vmem:[%s1214_s29 + $0x68] sm:$0xff]  ;;  %v253_v14 = vld [vmem:[%s1214_s29 + $0x70] sm:$0xff] }
  0x1d   : > { %250 = vst [vmem:[%s1219_s30 + $0x60] sm:$0xff] %v249_v12  ;;  %252 = vst [vmem:[%s1219_s30 + $0x68] sm:$0xff] %v251_v13  ;;  %v255_v15 = vld [vmem:[%s1214_s29 + $0x78] sm:$0xff]  ;;  %v257_v16 = vld [vmem:[%s1214_s29 + $0x100] sm:$0xff] }
  0x1e   : > { %254 = vst [vmem:[%s1219_s30 + $0x70] sm:$0xff] %v253_v14  ;;  %v259_v17 = vld [vmem:[%s1214_s29 + $0x108] sm:$0xff]  ;;  %256 = vst [vmem:[%s1219_s30 + $0x78] sm:$0xff] %v255_v15  ;;  %v261_v18 = vld [vmem:[%s1214_s29 + $0x110] sm:$0xff] }
  0x1f   : > { %258 = vst [vmem:[%s1219_s30 + $0x80] sm:$0xff] %v257_v16  ;;  %260 = vst [vmem:[%s1219_s30 + $0x88] sm:$0xff] %v259_v17  ;;  %v263_v19 = vld [vmem:[%s1214_s29 + $0x118] sm:$0xff]  ;;  %v265_v20 = vld [vmem:[%s1214_s29 + $0x120] sm:$0xff] }
  0x20   : > { %262 = vst [vmem:[%s1219_s30 + $0x90] sm:$0xff] %v261_v18  ;;  %264 = vst [vmem:[%s1219_s30 + $0x98] sm:$0xff] %v263_v19  ;;  %v267_v21 = vld [vmem:[%s1214_s29 + $0x128] sm:$0xff]  ;;  %v269_v22 = vld [vmem:[%s1214_s29 + $0x130] sm:$0xff] }
  0x21   : > { %266 = vst [vmem:[%s1219_s30 + $0xa0] sm:$0xff] %v265_v20  ;;  %v271_v23 = vld [vmem:[%s1214_s29 + $0x138] sm:$0xff]  ;;  %268 = vst [vmem:[%s1219_s30 + $0xa8] sm:$0xff] %v267_v21  ;;  %v273_v24 = vld [vmem:[%s1214_s29 + $0x140] sm:$0xff] }
  0x22   : > { %270 = vst [vmem:[%s1219_s30 + $0xb0] sm:$0xff] %v269_v22  ;;  %272 = vst [vmem:[%s1219_s30 + $0xb8] sm:$0xff] %v271_v23  ;;  %v275_v25 = vld [vmem:[%s1214_s29 + $0x148] sm:$0xff]  ;;  %v277_v26 = vld [vmem:[%s1214_s29 + $0x150] sm:$0xff] }
  0x23   : > { %274 = vst [vmem:[%s1219_s30 + $0xc0] sm:$0xff] %v273_v24  ;;  %276 = vst [vmem:[%s1219_s30 + $0xc8] sm:$0xff] %v275_v25  ;;  %v279_v27 = vld [vmem:[%s1214_s29 + $0x158] sm:$0xff]  ;;  %v281_v28 = vld [vmem:[%s1214_s29 + $0x160] sm:$0xff] }
  0x24   : > { %278 = vst [vmem:[%s1219_s30 + $0xd0] sm:$0xff] %v277_v26  ;;  %v283_v29 = vld [vmem:[%s1214_s29 + $0x168] sm:$0xff]  ;;  %280 = vst [vmem:[%s1219_s30 + $0xd8] sm:$0xff] %v279_v27  ;;  %v285_v30 = vld [vmem:[%s1214_s29 + $0x170] sm:$0xff] }
  0x25   : > { %282 = vst [vmem:[%s1219_s30 + $0xe0] sm:$0xff] %v281_v28  ;;  %284 = vst [vmem:[%s1219_s30 + $0xe8] sm:$0xff] %v283_v29  ;;  %v287_v31 = vld [vmem:[%s1214_s29 + $0x178] sm:$0xff] }
  0x26   : > { %286 = vst [vmem:[%s1219_s30 + $0xf0] sm:$0xff] %v285_v30  ;;  %288 = vst [vmem:[%s1219_s30 + $0xf8] sm:$0xff] %v287_v31 }
  0x27 PF: > { %294 = sbr.rel (!%p1185_p4) target bundleno = 45 (0x2d), region = 58  ;;  %s296_s3 = sand.u32 (%p1185_p4), 1, %s1115_s11  }
  0x28   : > { %s853_s4 = sshll.u32 (%p1185_p4), %s1123_s13, 3  ;;  %s852_s5 = sshll.u32 (%p1185_p4), %s296_s3, 5 }
  0x29   : > { %s301_s8 = scalar_lea.vmem (%p1185_p4), %s1406_s1, %s853_s4  ;;  %s298_s15 = scalar_lea.vmem (%p1185_p4), [#allocation4], %s852_s5 }
  0x2a   : > { %v336_v32 = vld [vmem:[%s301_s8] sm:$0xff] (%p1185_p4)  ;;  %v338_v33 = vld [vmem:[%s301_s8 + $0x10] sm:$0xff] (%p1185_p4) }
  0x2b   : > { %v340_v34 = vld [vmem:[%s301_s8 + $0x20] sm:$0xff] (%p1185_p4)  ;;  %337 = vst [vmem:[%s298_s15] sm:$0xff] (%p1185_p4), %v336_v32  ;;  %339 = vst [vmem:[%s298_s15 + $0x8] sm:$0xff] (%p1185_p4), %v338_v33  ;;  %v342_v35 = vld [vmem:[%s301_s8 + $0x30] sm:$0xff] (%p1185_p4) }
  0x2c   : > { %341 = vst [vmem:[%s298_s15 + $0x10] sm:$0xff] %v340_v34  ;;  %343 = vst [vmem:[%s298_s15 + $0x18] sm:$0xff] %v342_v35 }
  0x2d PF: > { %p854_p11 = scmp.ge.s32.totalorder %s1127_s14, 1  ;;  %p348_p12 = scmp.lt.s32.totalorder %s1127_s14, 3 }
  0x2f   : > { %p349_p13 = pnand %p854_p11, %p348_p12 }
  0x30   : > { %s1292_s16 = sand.u32 (!%p349_p13), 1, %s1111_s10   ;;  %s875_s26 = sshll.u32 (!%p349_p13), %s1119_s12, 5 }
  0x31   : > { %352 = sbr.rel (%p349_p13) target bundleno = 462 (0x1ce), region = 96  ;;  %s855_s18 = sshll.u32 (!%p349_p13), %s1292_s16, 8 }
  0x32   : > { %s1303_s19 = scalar_lea.vmem (!%p349_p13), [#allocation3], %s855_s18  ;;  %s856_s21 = sshll.u32 (!%p349_p13), %s1292_s16, 5 }
  0x33   : > { %s364_s24 = scalar_lea.vmem (!%p349_p13), [#allocation4], %s856_s21  ;;  %s857_s25 = sshll.u32 (!%p349_p13), %s1292_s16, 1 }
  0x34   : > { %s386_s27 = scalar_lea.vmem (!%p349_p13), [#allocation5], %s857_s25  ;;  %s1363_s12 = scalar_lea.hbm (!%p349_p13), %s1407_s2, %s875_s26 }
  0x35   : > { %s752_s28 = sshll.u32 (!%p349_p13), %s386_s27, 4  ;;  %s739_s3 = scalar_lea.sflag (!%p349_p13), [#allocation6], %s1292_s16  ;;  %s753_s28 = int_to_ptr.vmem [resolvable:$true] %s752_s28 }
  0x36   : > { %vm394_vm0 = vcmask 523264   ;;  %v1129_v36 = vmov 0.0   ;;  %v426_v37 = vld [vmem:[%s1303_s19 + $0x78] sm:$0xff]  ;;  %v425_v39 = vld [vmem:[%s1303_s19 + $0x70] sm:$0xff]  ;;  %v424_v41 = vld [vmem:[%s1303_s19 + $0x68] sm:$0xff]  ;;  %vm698_vm1 = vcmask 130112  }
  0x37   : > { %396 = vst.msk [vmem:[#allocation2 + $0x8] sm:$0xff] %vm394_vm0, %v1129_v36  ;;  %395 = vst.msk [vmem:[#allocation2] sm:$0xff] %vm394_vm0, %v1129_v36  ;;  %v873_v38 = vld [vmem:[%s1303_s19 + $0xf8] sm:$0xff]  ;;  %919 = vmatprep.subr.mxu0 %v426_v37  ;;  %v872_v40 = vld [vmem:[%s1303_s19 + $0xf0] sm:$0xff]  ;;  %vm705_vm2 = vcmask 195712   ;;  %vm712_vm3 = vcmask 261312  }
  0x38   : > { %397 = vst.msk [vmem:[#allocation2 + $0x10] sm:$0xff] %vm394_vm0, %v1129_v36  ;;  %398 = vst.msk [vmem:[#allocation2 + $0x18] sm:$0xff] %vm394_vm0, %v1129_v36  ;;  %957 = vmatprep.subr.mxu1 %v873_v38  ;;  %920 = vmatpush3.msra.mxu0 %v426_v37  ;;  %v871_v42 = vld [vmem:[%s1303_s19 + $0xe8] sm:$0xff]  ;;  %v423_v43 = vld [vmem:[%s1303_s19 + $0x60] sm:$0xff]  ;;  %vm733_vm4 = vcmask 1041409   ;;  %vm736_vm5 = vcmask 254976  }
  0x39   : > { %399 = vst.msk [vmem:[#allocation2 + $0x20] sm:$0xff] %vm394_vm0, %v1129_v36  ;;  %400 = vst.msk [vmem:[#allocation2 + $0x28] sm:$0xff] %vm394_vm0, %v1129_v36  ;;  %958 = vmatpush3.msra.mxu1 %v873_v38  ;;  %921 = vmatprep.subr.mxu0 %v425_v39  ;;  %v870_v44 = vld [vmem:[%s1303_s19 + $0xe0] sm:$0xff]  ;;  %v422_v45 = vld [vmem:[%s1303_s19 + $0x58] sm:$0xff]  ;;  %s1051_s4 = scalar_lea.vmem %s753_s28, 32  ;;  %s1130_s5 = smov [#allocation5]  }
  0x3a   : > { %401 = vst.msk [vmem:[#allocation2 + $0x30] sm:$0xff] %vm394_vm0, %v1129_v36  ;;  %402 = vst.msk [vmem:[#allocation2 + $0x38] sm:$0xff] %vm394_vm0, %v1129_v36  ;;  %959 = vmatprep.subr.mxu1 %v872_v40  ;;  %922 = vmatpush3.msra.mxu0 %v425_v39  ;;  %v869_v46 = vld [vmem:[%s1303_s19 + $0xd8] sm:$0xff]  ;;  %v421_v47 = vld [vmem:[%s1303_s19 + $0x50] sm:$0xff]  ;;  %p1052_p0 = scmp.ne.s32.totalorder %s753_s28, %s1051_s4  ;;  %s1055_s6 = sshll.u32 %s1130_s5, 4  ;;  %s1056_s6 = int_to_ptr.vmem [resolvable:$false] %s1055_s6 }
  0x3b   : > { %960 = vmatpush3.msra.mxu1 %v872_v40  ;;  %923 = vmatprep.subr.mxu0 %v424_v41  ;;  %v868_v48 = vld [vmem:[%s1303_s19 + $0xd0] sm:$0xff]  ;;  %v420_v49 = vld [vmem:[%s1303_s19 + $0x48] sm:$0xff]  ;;  %v419_v51 = vld [vmem:[%s1303_s19 + $0x40] sm:$0xff]  ;;  %s1057_s7 = scalar_lea.vmem %s1056_s6, 64  ;;  %p1058_p3 = scmp.lt.s32.totalorder %s753_s28, %s1056_s6 }
  0x3c   : > { %961 = vmatprep.subr.mxu1 %v871_v42  ;;  %924 = vmatpush3.msra.mxu0 %v424_v41  ;;  %v867_v50 = vld [vmem:[%s1303_s19 + $0xc8] sm:$0xff]  ;;  %v866_v52 = vld [vmem:[%s1303_s19 + $0xc0] sm:$0xff]  ;;  %v418_v53 = vld [vmem:[%s1303_s19 + $0x38] sm:$0xff]  ;;  %p1053_p1 = pnand %p1052_p0, %p1189_p5  ;;  %p1059_p4 = scmp.lt.s32.totalorder %s1057_s7, %s1051_s4 }
  0x3d   : > { %962 = vmatpush3.msra.mxu1 %v871_v42  ;;  %925 = vmatprep.subr.mxu0 %v423_v43  ;;  %v865_v54 = vld [vmem:[%s1303_s19 + $0xb8] sm:$0xff]  ;;  %v417_v55 = vld [vmem:[%s1303_s19 + $0x30] sm:$0xff]  ;;  %v416_v57 = vld [vmem:[%s1303_s19 + $0x28] sm:$0xff] }
  0x3e   : > { %963 = vmatprep.subr.mxu1 %v870_v44  ;;  %926 = vmatpush3.msra.mxu0 %v423_v43  ;;  %v864_v56 = vld [vmem:[%s1303_s19 + $0xb0] sm:$0xff]  ;;  %v863_v58 = vld [vmem:[%s1303_s19 + $0xa8] sm:$0xff]  ;;  %v415_v59 = vld [vmem:[%s1303_s19 + $0x20] sm:$0xff]  ;;  %p1054_p2 = pneg %p1053_p1  ;;  %p1060_p6 = por %p1059_p4, %p1058_p3 }
  0x3f   : > { %964 = vmatpush3.msra.mxu1 %v870_v44  ;;  %927 = vmatprep.subr.mxu0 %v422_v45  ;;  %v862_v60 = vld [vmem:[%s1303_s19 + $0xa0] sm:$0xff]  ;;  %v414_v61 = vld [vmem:[%s1303_s19 + $0x18] sm:$0xff]  ;;  %v413_v63 = vld [vmem:[%s1303_s19 + $0x10] sm:$0xff] }
  0x40   : > { %965 = vmatprep.subr.mxu1 %v869_v46  ;;  %928 = vmatpush3.msra.mxu0 %v422_v45  ;;  %v861_v62 = vld [vmem:[%s1303_s19 + $0x98] sm:$0xff]  ;;  %v860_v0 = vld [vmem:[%s1303_s19 + $0x90] sm:$0xff]  ;;  %v412_v1 = vld [vmem:[%s1303_s19 + $0x8] sm:$0xff]  ;;  %p1061_p7 = pnand %p1060_p6, %p1054_p2 }
  0x41   : > { %966 = vmatpush3.msra.mxu1 %v869_v46  ;;  %929 = vmatprep.subr.mxu0 %v421_v47  ;;  %v859_v2 = vld [vmem:[%s1303_s19 + $0x88] sm:$0xff]  ;;  %v411_v3 = vld [vmem:[%s1303_s19] sm:$0xff]  ;;  %v405_v7 = vld [vmem:[%s364_s24 + $0x10] sm:$0xff] }
  0x42   : > { %967 = vmatprep.subr.mxu1 %v868_v48  ;;  %930 = vmatpush3.msra.mxu0 %v421_v47  ;;  %v858_v4 = vld [vmem:[%s1303_s19 + $0x80] sm:$0xff]  ;;  %v404_v6 = vld [vmem:[%s364_s24 + $0x8] sm:$0xff]  ;;  %v406_v8 = vld [vmem:[%s364_s24 + $0x18] sm:$0xff] }
  0x43   : > { %968 = vmatpush3.msra.mxu1 %v868_v48  ;;  %931 = vmatprep.subr.mxu0 %v420_v49  ;;  %v403_v5 = vld [vmem:[%s364_s24] sm:$0xff]  ;;  %v408_v9 = vld [vmem:[#allocation2 + $0x8] sm:$0xff]  ;;  %v410_v19 = vld [vmem:[#allocation2 + $0x18] sm:$0xff] }
  0x44   : > { %969 = vmatprep.subr.mxu1 %v867_v50  ;;  %932 = vmatpush3.msra.mxu0 %v420_v49  ;;  %v523_v10 = vld [vmem:[#allocation2 + $0x28] sm:$0xff]  ;;  %v407_v13 = vld [vmem:[#allocation2] sm:$0xff]  ;;  %v525_v20 = vld [vmem:[#allocation2 + $0x38] sm:$0xff]  ;;  %v687_v49 = vlaneseq }
  0x45   : > { %970 = vmatpush3.msra.mxu1 %v867_v50  ;;  %933 = vmatprep.subr.mxu0 %v419_v51  ;;  %v522_v14 = vld [vmem:[#allocation2 + $0x20] sm:$0xff]  ;;  %v409_v25 = vld [vmem:[#allocation2 + $0x10] sm:$0xff] }
  0x46   : > { %971 = vmatprep.subr.mxu1 %v866_v52  ;;  %934 = vmatpush3.msra.mxu0 %v419_v51  ;;  %v524_v26 = vld [vmem:[#allocation2 + $0x30] sm:$0xff]  ;;  %v688_v50 = vand.u32 127, %v687_v49 }
  0x47   : > { %972 = vmatpush3.msra.mxu1 %v866_v52  ;;  %935 = vmatprep.subr.mxu0 %v418_v53 }
  0x48   : > { %973 = vmatprep.subr.mxu1 %v865_v54  ;;  %936 = vmatpush3.msra.mxu0 %v418_v53  ;;  %v690_v53 = vshrl.u32 %v687_v49, 7 }
  0x49   : > { %974 = vmatpush3.msra.mxu1 %v865_v54  ;;  %937 = vmatprep.subr.mxu0 %v417_v55  ;;  %v693_v54 = vadd.s32 4294967288, %v688_v50 }
  0x4a   : > { %975 = vmatprep.subr.mxu1 %v864_v56  ;;  %938 = vmatpush3.msra.mxu0 %v417_v55 }
  0x4b   : > { %976 = vmatpush3.msra.mxu1 %v864_v56  ;;  %939 = vmatprep.subr.mxu0 %v416_v57 }
  0x4c   : > { %977 = vmatprep.subr.mxu1 %v863_v58  ;;  %940 = vmatpush3.msra.mxu0 %v416_v57  ;;  %v700_v57 = vadd.s32 4294967280, %v688_v50 }
  0x4d   : > { %978 = vmatpush3.msra.mxu1 %v863_v58  ;;  %941 = vmatprep.subr.mxu0 %v415_v59  ;;  %v691_v58 = vsub.s32 %v688_v50, %v690_v53 }
  0x4e   : > { %979 = vmatprep.subr.mxu1 %v862_v60  ;;  %942 = vmatpush3.msra.mxu0 %v415_v59 }
  0x4f   : > { %980 = vmatpush3.msra.mxu1 %v862_v60  ;;  %943 = vmatprep.subr.mxu0 %v414_v61 }
  0x50   : > { %981 = vmatprep.subr.mxu1 %v861_v62  ;;  %944 = vmatpush3.msra.mxu0 %v414_v61  ;;  %v707_v61 = vadd.s32 4294967272, %v688_v50 }
  0x51   : > { %982 = vmatpush3.msra.mxu1 %v861_v62  ;;  %945 = vmatprep.subr.mxu0 %v413_v63  ;;  %v696_v62 = vsub.s32 %v693_v54, %v690_v53 }
  0x52   : > { %983 = vmatprep.subr.mxu1 %v860_v0  ;;  %946 = vmatpush3.msra.mxu0 %v413_v63  ;;  %v703_v63 = vsub.s32 %v700_v57, %v690_v53 }
  0x53   : > { %984 = vmatpush3.msra.mxu1 %v860_v0  ;;  %947 = vmatprep.subr.mxu0 %v412_v1 }
  0x54   : > { %985 = vmatprep.subr.mxu1 %v859_v2  ;;  %948 = vmatpush3.msra.mxu0 %v412_v1 }
  0x55   : > { %986 = vmatpush3.msra.mxu1 %v859_v2  ;;  %949 = vmatprep.subr.mxu0 %v411_v3 }
  0x56   : > { %987 = vmatprep.subr.mxu1 %v858_v4  ;;  %950 = vmatpush3.msra.mxu0 %v411_v3 }
  0x57   : > { %951 = vmatprep.mubr.f32.mxu0 %v403_v5  ;;  %988 = vmatpush3.msra.mxu1 %v858_v4 }
  0x58   : > { %989 = vmatprep.mubr.f32.mxu1 %v403_v5  ;;  %952 = vmatmul.mubr.f32.vlgmr.msra.gmra.mxu0 %v404_v6 }
  0x59   : > { %990 = vmatmul.mubr.f32.vlgmr.msra.gmra.mxu1 %v404_v6  ;;  %954 = vmatprep.mubr.f32.mxu0 %v405_v7 }
  0x5a   : > { %992 = vmatprep.mubr.f32.mxu1 %v405_v7 }
  0x5c   : > { %955 = vmatmul.mubr.f32.gmra.mxu0 %v406_v8 }
  0x5d   : > { %993 = vmatmul.mubr.f32.gmra.mxu1 %v406_v8  ;;  %v710_v8 = vsub.s32 %v707_v61, %v690_v53 }
 0x118   : > { %v953_v11 = vpop.f32.mrf.mxu0 }
 0x119   : > { %v991_v12 = vpop.f32.mrf.mxu1  ;;  %v513_v15 = vadd.f32 %v953_v11, %v408_v9 }
 0x11a   : > { %v629_v16 = vadd.f32 %v991_v12, %v523_v10  ;;  %v493_v17 = vpop.f32.mrf.mxu0 }
 0x11b   : > { %v609_v18 = vpop.f32.mrf.mxu1  ;;  %518 = vst.msk [vmem:[#allocation2 + $0x8] sm:$0xff] %vm394_vm0, %v513_v15  ;;  %v512_v21 = vadd.f32 %v493_v17, %v407_v13 }
 0x11c   : > { %633 = vst.msk [vmem:[#allocation2 + $0x28] sm:$0xff] %vm394_vm0, %v629_v16  ;;  %v628_v22 = vadd.f32 %v609_v18, %v522_v14  ;;  %v956_v23 = vpop.f32.mrf.mxu0 }
 0x11d   : > { %v994_v24 = vpop.f32.mrf.mxu1  ;;  %517 = vst.msk [vmem:[#allocation2] sm:$0xff] %vm394_vm0, %v512_v21  ;;  %v515_v27 = vadd.f32 %v956_v23, %v410_v19 }
 0x11e   : > { %632 = vst.msk [vmem:[#allocation2 + $0x20] sm:$0xff] %vm394_vm0, %v628_v22  ;;  %v631_v28 = vadd.f32 %v994_v24, %v525_v20  ;;  %v503_v29 = vpop.f32.mrf.mxu0 }
 0x11f   : > { %v619_v30 = vpop.f32.mrf.mxu1  ;;  %520 = vst.msk [vmem:[#allocation2 + $0x18] sm:$0xff] %vm394_vm0, %v515_v27  ;;  %v514_v31 = vadd.f32 %v503_v29, %v409_v25 }
 0x120   : > { %635 = vst.msk [vmem:[#allocation2 + $0x38] sm:$0xff] %vm394_vm0, %v631_v28  ;;  %v630_v32 = vadd.f32 %v619_v30, %v524_v26 }
 0x121   : > { %519 = vst.msk [vmem:[#allocation2 + $0x10] sm:$0xff] %vm394_vm0, %v514_v31 }
 0x122   : > { %634 = vst.msk [vmem:[#allocation2 + $0x30] sm:$0xff] %vm394_vm0, %v630_v32  ;;  %v640_v34 = vld [vmem:[#allocation2 + $0x8] sm:$0xff] }
 0x123   : > { %v644_v33 = vld [vmem:[#allocation2 + $0x28] sm:$0xff]  ;;  %v650_v36 = vsel %vm394_vm0, %v640_v34, 0.0 }
 0x124   : > { %v662_v35 = vsel %vm394_vm0, %v644_v33, 0.0  ;;  %651 = vadd.xlane.f32.xlu0 %v650_v36  ;;  %v639_v38 = vld [vmem:[#allocation2] sm:$0xff] }
 0x125   : > { %663 = vadd.xlane.f32.xlu1 %v662_v35  ;;  %v643_v37 = vld [vmem:[#allocation2 + $0x20] sm:$0xff]  ;;  %v647_v40 = vsel %vm394_vm0, %v639_v38, 0.0 }
 0x126   : > { %v659_v39 = vsel %vm394_vm0, %v643_v37, 0.0  ;;  %v642_v46 = vld [vmem:[#allocation2 + $0x18] sm:$0xff] }
 0x127   : > { %v646_v45 = vld [vmem:[#allocation2 + $0x38] sm:$0xff]  ;;  %v656_v48 = vsel %vm394_vm0, %v642_v46, 0.0 }
 0x128   : > { %648 = vadd.xlane.f32.xlu0 %v647_v40  ;;  %v641_v42 = vld [vmem:[#allocation2 + $0x10] sm:$0xff]  ;;  %v668_v47 = vsel %vm394_vm0, %v646_v45, 0.0 }
 0x129   : > { %660 = vadd.xlane.f32.xlu1 %v659_v39  ;;  %v645_v41 = vld [vmem:[#allocation2 + $0x30] sm:$0xff]  ;;  %v653_v44 = vsel %vm394_vm0, %v641_v42, 0.0 }
 0x12a   : > { %v665_v43 = vsel %vm394_vm0, %v645_v41, 0.0 }
 0x12c   : > { %654 = vadd.xlane.f32.xlu0 %v653_v44 }
 0x12d   : > { %666 = vadd.xlane.f32.xlu1 %v665_v43 }
 0x130   : > { %657 = vadd.xlane.f32.xlu0 %v656_v48 }
 0x131   : > { %669 = vadd.xlane.f32.xlu1 %v668_v47 }
 0x1ad   : > { %v652_v52 = vpop.xlane.xlu0 %651 }
 0x1ae   : > { %v664_v51 = vpop.xlane.xlu1 %663  ;;  %v672_v3 = vmul.f32 0.015625, %v652_v52 }
 0x1af   : > { %v676_v2 = vmul.f32 0.015625, %v664_v51 }
 0x1b0   : > { %v697_v14 = vrot.slane %v672_v3, %v696_v62 }
 0x1b1   : > { %v649_v56 = vpop.xlane.xlu0 %648  ;;  %v721_v13 = vrot.slane %v676_v2, %v696_v62 }
 0x1b2   : > { %v661_v55 = vpop.xlane.xlu1 %660  ;;  %v671_v60 = vmul.f32 0.015625, %v649_v56 }
 0x1b3   : > { %v675_v59 = vmul.f32 0.015625, %v661_v55 }
 0x1b4   : > { %v692_v7 = vrot.slane %v671_v60, %v691_v58 }
 0x1b5   : > { %v655_v1 = vpop.xlane.xlu0 %654  ;;  %v717_v6 = vrot.slane %v675_v59, %v691_v58 }
 0x1b6   : > { %v667_v0 = vpop.xlane.xlu1 %666  ;;  %v673_v5 = vmul.f32 0.015625, %v655_v1  ;;  %v699_v18 = vsel %vm698_vm1, %v697_v14, %v692_v7 }
 0x1b7   : > { %v677_v4 = vmul.f32 0.015625, %v667_v0  ;;  %v722_v17 = vsel %vm698_vm1, %v721_v13, %v717_v6 }
 0x1b8   : > { %v704_v10 = vrot.slane %v673_v5, %v703_v63 }
 0x1b9   : > { %v726_v9 = vrot.slane %v677_v4, %v703_v63  ;;  %v658_v12 = vpop.xlane.xlu0 %657 }
 0x1ba   : > { %v670_v11 = vpop.xlane.xlu1 %669  ;;  %v674_v16 = vmul.f32 0.015625, %v658_v12  ;;  %v706_v22 = vsel %vm705_vm2, %v704_v10, %v699_v18 }
 0x1bb   : > { %v678_v15 = vmul.f32 0.015625, %v670_v11  ;;  %v727_v21 = vsel %vm705_vm2, %v726_v9, %v722_v17 }
 0x1bc   : > { %v711_v20 = vrot.slane %v674_v16, %v710_v8 }
 0x1bd   : > { %v731_v19 = vrot.slane %v678_v15, %v710_v8 }
 0x1be   : > { %v713_v24 = vsel %vm712_vm3, %v711_v20, %v706_v22 }
 0x1bf   : > { %v732_v23 = vsel %vm712_vm3, %v731_v19, %v727_v21 }
 0x1c0   : > { %v734_v25 = vsel %vm733_vm4, %v732_v23, %v713_v24 }
 0x1c1   : > { %737 = vst.msk [vmem:[%s386_s27] sm:$0x3] %vm736_vm5, %v734_v25 }
 0x1c2   : > { %1064 = shalt.err (!%p1061_p7)
}
 0x1c3   : > { %s1065_s8 = scalar_lea.hbm %s1363_s12, 32  ;;  %s1069_s18 = scalar_lea.hbm %s1407_s2, 64 }
 0x1c4   : > { %p1066_p8 = scmp.ne.s32.totalorder %s1363_s12, %s1065_s8  ;;  %p1070_p13 = scmp.lt.s32.totalorder %s1363_s12, %s1407_s2 }
 0x1c5   : > { %p1071_p0 = scmp.lt.s32.totalorder %s1069_s18, %s1065_s8 }
 0x1c6   : > { %p1067_p11 = pnand %p1066_p8, %p1189_p5 }
 0x1c7   : > { %p1072_p1 = por %p1071_p0, %p1070_p13 }
 0x1c8   : > { %p1068_p12 = pneg %p1067_p11 }
 0x1ca   : > { %p1073_p2 = pnand %p1072_p1, %p1068_p12 }
 0x1cc   : > { %1076 = shalt.err (!%p1073_p2)
}
 0x1cd   : > { %995 = dma.vmem_to_hbm [thread:$0]  (%p1189_p5), %s753_s28, 32, %s1363_s12, %s739_s3  }
 0x1ce PF: > { %s764_s24 = sand.u32 1, %s1107_s9   ;;  %p998_p3 = pnand %p848_p10, %p1200_p9 }
 0x1cf   : > { %s765_s25 = scalar_lea.sflag [#allocation6], %s764_s24 }
 0x1d0   : > { %p999_p4 = pneg %p998_p3 }
 0x1d2   : > { %1102 = dma.done.wait (%p999_p4), %s765_s25, 32  }
 0x1d3   : > { %1104 = vsyncadd (%p999_p4), %s765_s25, 4294967264  ;;  %s15_s14 = sadd.s32 1, %s1127_s14   ;;  %s1411_s9 = smov %s1111_s10 }
 0x1d4   : > { %p12_p6 = scmp.ge.s32.totalorder %s15_s14, 4   ;;  %s1412_s10 = smov %s1115_s11 }
 0x1d5   : > { %s1413_s11 = smov %s1198_s22  ;;  %s1414_s12 = smov %s1123_s13 }
 0x1d6   : > { %s1415_s13 = smov %s1417_s17  ;;  %14 = sbr.rel (!%p12_p6) target bundleno = 4 (0x4), region = 162 }
 0x1db   :  { %770 = vsyncpa [#allocation6], 1 }
 0x1dc   :  { %772 = vsyncpa [#allocation6 + $0x1], 1 }

</bundles_post_ra>
